<compile_context>
chip_gen: v6e
topology: v6e:2x2x1
jax: 0.10.0
libtpu: 0.0.40
codegen_flags: <defaults>
</compile_context>

<pallas_src>
import math

import jax
import jax.numpy as jnp
from jax.experimental import pallas as pl
from jax.experimental.pallas import tpu as pltpu


def _feature_norm_kernel(x_ref, shift_ref, inv_scale_ref, o_ref):
    # x_ref: (tile_rows, L); shift_ref / inv_scale_ref: (1, L), broadcast over
    # rows.  Multiply by the precomputed reciprocal instead of dividing (the
    # divide was done once on the tiny (F,) vector in the wrapper).
    o_ref[...] = (x_ref[...] - shift_ref[...]) * inv_scale_ref[...]


def _round_up(a, b):
    return ((a + b - 1) // b) * b


def _pick_row_grid(rows, max_tile_rows):
    """Split `rows` (multiple of 8) into (grid_n, tile_rows) with tile_rows % 8 == 0."""
    grid_n = max(1, pl.cdiv(rows, max_tile_rows))
    if grid_n == 1 and rows >= 16:
        grid_n = 2  # give both v7x TensorCores a tile
    tile_rows = _round_up(pl.cdiv(rows, grid_n), 8)
    return grid_n, tile_rows


def _run(x2, shift_row, inv_row, grid_n, tile_rows):
    rows_pad, L = x2.shape
    return pl.pallas_call(
        _feature_norm_kernel,
        out_shape=jax.ShapeDtypeStruct((rows_pad, L), x2.dtype),
        grid_spec=pltpu.PrefetchScalarGridSpec(
            num_scalar_prefetch=0,
            grid=(grid_n,),
            in_specs=[
                pl.BlockSpec((tile_rows, L), lambda i: (i, 0)),
                pl.BlockSpec((1, L), lambda i: (0, 0)),
                pl.BlockSpec((1, L), lambda i: (0, 0)),
            ],
            out_specs=pl.BlockSpec((tile_rows, L), lambda i: (i, 0)),
        ),
        compiler_params=pltpu.CompilerParams(
            dimension_semantics=("parallel",)),
    )(x2, shift_row, inv_row)


def feature_normalization(x, shift, scale, *, target_block_bytes=4 * 1024 * 1024):
    """(x - shift) / scale, computed in a Pallas TPU kernel.

    x:     (B, F)
    shift: (F,)
    scale: (F,)
    """
    B, F = x.shape
    elem_bytes = jnp.dtype(x.dtype).itemsize
    shift = shift.astype(x.dtype)
    inv_scale = (1.0 / scale).astype(x.dtype)  # exact divide, once, on (F,)

    # Smallest lane width that is a multiple of both 128 and F, so one tiled
    # (1, L) shift / inv_scale row is valid for every flattened row.
    lcm_f = (F * 128) // math.gcd(F, 128)

    if lcm_f * 8 * elem_bytes <= target_block_bytes:
        # ---------- lane-dense flattened path (narrow / awkward F) ----------
        L = lcm_f * max(1, 512 // lcm_f)  # widen small L up to >= 512 lanes
        reps = L // F
        shift_row = jnp.tile(shift, reps).reshape(1, L)
        inv_row = jnp.tile(inv_scale, reps).reshape(1, L)

        total = B * F
        rows = _round_up(pl.cdiv(total, L), 8)
        max_tile_rows = max(8, (target_block_bytes // (L * elem_bytes)) // 8 * 8)
        grid_n, tile_rows = _pick_row_grid(rows, max_tile_rows)
        rows_pad = tile_rows * grid_n

        pad = rows_pad * L - total
        x_flat = x.reshape(-1)
        if pad:
            x_flat = jnp.pad(x_flat, (0, pad))
        x2 = x_flat.reshape(rows_pad, L)

        out2 = _run(x2, shift_row, inv_row, grid_n, tile_rows)
        out_flat = out2.reshape(-1)
        if pad:
            out_flat = out_flat[:total]
        return out_flat.reshape(B, F)

    # ---------- fallback: wide F, block last dim = full feature dim ----------
    shift_row = shift.reshape(1, F)
    inv_row = inv_scale.reshape(1, F)
    max_tile_b = max(8, (target_block_bytes // (F * elem_bytes)) // 8 * 8)
    rows = _round_up(B, 8)
    grid_n, tile_b = _pick_row_grid(rows, max_tile_b)
    B_pad = tile_b * grid_n

    x2 = jnp.pad(x, ((0, B_pad - B), (0, 0))) if B_pad != B else x
    out2 = _run(x2, shift_row, inv_row, grid_n, tile_b)
    return out2[:B] if B_pad != B else out2


if __name__ == "__main__":
    key = jax.random.PRNGKey(0)
    k_x, k_shift, k_scale, k_x2 = jax.random.split(key, 4)

    # Shapes implied by forward: x (batch, ft_size); shift/scale (ft_size,).
    batch, ft_size = 16, 32
    x = jax.random.normal(k_x, (batch, ft_size), dtype=jnp.float32)

    # Module defaults are shift=0, scale=1; use nontrivial values to exercise
    # the math.
    shift = jax.random.normal(k_shift, (ft_size,), dtype=jnp.float32)
    scale = 1.0 + jnp.abs(jax.random.normal(k_scale, (ft_size,), dtype=jnp.float32))

    out = jax.block_until_ready(feature_normalization(x, shift, scale))
    ref = (x - shift[None, :]) / scale[None, :]
    assert out.shape == (batch, ft_size)
    assert jnp.allclose(out, ref, atol=1e-5, rtol=1e-5)

    # Ragged / non-power-of-two shapes exercise the wrapper padding path.
    b2, f2 = 13, 48
    x_b = jax.random.normal(k_x2, (b2, f2), dtype=jnp.float32)
    shift_b = jnp.linspace(-1.0, 1.0, f2, dtype=jnp.float32)
    scale_b = jnp.linspace(0.5, 2.0, f2, dtype=jnp.float32)
    out_b = jax.block_until_ready(feature_normalization(x_b, shift_b, scale_b))
    ref_b = (x_b - shift_b[None, :]) / scale_b[None, :]
    assert out_b.shape == (b2, f2)
    assert jnp.allclose(out_b, ref_b, atol=1e-5, rtol=1e-5)

    print("KERNEL_OK")
</pallas_src>

<mosaic_0001>
module attributes {stable_mosaic.version = 11 : i64} {
  func.func @_feature_norm_kernel(%arg0: i32, %arg1: memref<8x512xf32, #tpu.memory_space<vmem>>, %arg2: memref<1x512xf32, #tpu.memory_space<vmem>>, %arg3: memref<1x512xf32, #tpu.memory_space<vmem>>, %arg4: memref<8x512xf32, #tpu.memory_space<vmem>>) attributes {dimension_semantics = [#tpu.dimension_semantics<parallel>], iteration_bounds = array<i64: 1>, scalar_prefetch = 0 : i64, scratch_operands = 0 : i64, tpu.core_type = #tpu.core_type<tc>, window_params = [{transform_indices = @transform_0, window_bounds = array<i64: 8, 512>}, {pipeline_mode = #tpu.pipeline_mode<synchronous>, transform_indices = @transform_1, window_bounds = array<i64: 1, 512>}, {pipeline_mode = #tpu.pipeline_mode<synchronous>, transform_indices = @transform_2, window_bounds = array<i64: 1, 512>}, {transform_indices = @transform_3, window_bounds = array<i64: 8, 512>}]} {
    %c0 = arith.constant 0 : index
    %c0_0 = arith.constant 0 : index
    %0 = vector.load %arg1[%c0, %c0_0] : memref<8x512xf32, #tpu.memory_space<vmem>>, vector<8x512xf32>
    %c0_1 = arith.constant 0 : index
    %c0_2 = arith.constant 0 : index
    %1 = vector.load %arg2[%c0_1, %c0_2] : memref<1x512xf32, #tpu.memory_space<vmem>>, vector<1x512xf32>
    %2 = vector.broadcast %1 : vector<1x512xf32> to vector<8x512xf32>
    %3 = arith.subf %0, %2 : vector<8x512xf32>
    %c0_3 = arith.constant 0 : index
    %c0_4 = arith.constant 0 : index
    %4 = vector.load %arg3[%c0_3, %c0_4] : memref<1x512xf32, #tpu.memory_space<vmem>>, vector<1x512xf32>
    %5 = vector.broadcast %4 : vector<1x512xf32> to vector<8x512xf32>
    %6 = arith.mulf %3, %5 : vector<8x512xf32>
    %c0_5 = arith.constant 0 : index
    %c0_6 = arith.constant 0 : index
    %7 = vector.load %arg4[%c0_5, %c0_6] : memref<8x512xf32, #tpu.memory_space<vmem>>, vector<8x512xf32>
    tpu.vector_store %arg4[%c0_5, %c0_6], %6 {strides = array<i32>} : memref<8x512xf32, #tpu.memory_space<vmem>>, vector<8x512xf32>,
    return
  }
  func.func @transform_0(%arg0: i32) -> (i32, i32) {
    %c0_i32 = arith.constant 0 : i32
    %c0_i32_0 = arith.constant 0 : i32
    return %arg0, %c0_i32 : i32, i32
  }
  func.func @transform_1(%arg0: i32) -> (i32, i32) {
    %c0_i32 = arith.constant 0 : i32
    %c0_i32_0 = arith.constant 0 : i32
    %c0_i32_1 = arith.constant 0 : i32
    return %c0_i32, %c0_i32_0 : i32, i32
  }
  func.func @transform_2(%arg0: i32) -> (i32, i32) {
    %c0_i32 = arith.constant 0 : i32
    %c0_i32_0 = arith.constant 0 : i32
    %c0_i32_1 = arith.constant 0 : i32
    return %c0_i32, %c0_i32_0 : i32, i32
  }
  func.func @transform_3(%arg0: i32) -> (i32, i32) {
    %c0_i32 = arith.constant 0 : i32
    %c0_i32_0 = arith.constant 0 : i32
    return %arg0, %c0_i32 : i32, i32
  }
}

</mosaic_0001>

<bundles_post_ra>
// kernel: tpu_custom_call.1
= control target key start
LH: loop header
LB: loop body
LE: loop exit
PB: predicated region body
PF: predicated region fallthrough
CT: control target
= control target key end

     0   :  { %8 = vsyncpa [#allocation3], 0  ;;  %s252_s0 = inlined_call_operand.hbm [shape: f32[8,512], index: 0, kind: input, shape index: {}]   ;;  %s253_s1 = inlined_call_operand.hbm [shape: f32[1,512], index: 1, kind: input, shape index: {}]   ;;  %s254_s2 = inlined_call_operand.hbm [shape: f32[1,512], index: 2, kind: input, shape index: {}]   ;;  %s255_s3 = inlined_call_operand.hbm [shape: f32[8,512], index: 3, kind: output, shape index: {}]  }
   0x1   :  { %9 = vsyncpa [#allocation6], 0 }
   0x2   :  { %10 = vsyncpa [#allocation4], 0  ;;  %s216_s12 = smov [#allocation5]   ;;  %s217_s14 = smov [#allocation2]  }
   0x3   :  { %s27_s13 = sshll.u32 %s216_s12, 4  ;;  %s17_s15 = sshll.u32 %s217_s14, 4  ;;  %s28_s13 = int_to_ptr.vmem [resolvable:$true] %s27_s13  ;;  %s18_s15 = int_to_ptr.vmem [resolvable:$true] %s17_s15 }
   0x4   :  { %s138_s16 = scalar_lea.vmem %s28_s13, 64  ;;  %p143_p1 = scmp.lt.s32.totalorder %s28_s13, %s28_s13 }
   0x5   :  { %p139_p0 = scmp.ne.s32.totalorder %s28_s13, %s138_s16  ;;  %p144_p2 = scmp.lt.s32.totalorder %s138_s16, %s138_s16 }
   0x7   :  { %p145_p3 = por %p144_p2, %p143_p1 }
   0x9   :  { %p146_p4 = pnand %p145_p3, %p139_p0 }
   0xb   :  { %149 = shalt.err (!%p146_p4)
}
   0xc   :  { %30 = dma.hbm_to_vmem [thread:$0]  %s253_s1, 64, %s28_s13, [#allocation6]  }
   0xd   :  { %s158_s19 = scalar_lea.vmem %s18_s15, 512  ;;  %p163_p6 = scmp.lt.s32.totalorder %s18_s15, %s18_s15 }
   0xe   :  { %p159_p5 = scmp.ne.s32.totalorder %s18_s15, %s158_s19  ;;  %p164_p7 = scmp.lt.s32.totalorder %s158_s19, %s158_s19 }
  0x10   :  { %p165_p8 = por %p164_p7, %p163_p6 }
  0x12   :  { %p166_p9 = pnand %p165_p8, %p159_p5 }
  0x14   :  { %169 = shalt.err (!%p166_p9)
}
  0x15   :  { %20 = dma.hbm_to_vmem [thread:$0]  %s252_s0, 512, %s18_s15, [#allocation3]  }
  0x16   :  { %s218_s22 = smov [#allocation7]  }
  0x17   :  { %s37_s23 = sshll.u32 %s218_s22, 4  ;;  %s38_s23 = int_to_ptr.vmem [resolvable:$true] %s37_s23 }
  0x18   :  { %s178_s24 = scalar_lea.vmem %s38_s23, 64  ;;  %p183_p11 = scmp.lt.s32.totalorder %s38_s23, %s38_s23 }
  0x19   :  { %p179_p10 = scmp.ne.s32.totalorder %s38_s23, %s178_s24  ;;  %p184_p12 = scmp.lt.s32.totalorder %s178_s24, %s178_s24 }
  0x1b   :  { %p185_p13 = por %p184_p12, %p183_p11 }
  0x1d   :  { %p186_p0 = pnand %p185_p13, %p179_p10 }
  0x1f   :  { %189 = shalt.err (!%p186_p0)
}
  0x20   :  { %40 = dma.hbm_to_vmem [thread:$0]  %s254_s2, 64, %s38_s23, [#allocation6]  }
  0x21   :  { %210 = dma.done.wait [#allocation3], 512  }
  0x22   :  { %211 = vsyncadd [#allocation3], 4294966784 }
  0x23   :  { %212 = dma.done.wait [#allocation6], 128  }
  0x24   :  { %213 = vsyncadd [#allocation6], 4294967168  ;;  %v56_v0 = vlaneseq  ;;  %v50_v6 = vld [vmem:[#allocation2] sm:$0xff]  ;;  %v51_v11 = vld [vmem:[#allocation2 + $0x8] sm:$0xff]  ;;  %s219_s0 = smov [#allocation8]  }
  0x25   :  { %v54_v7 = vld [vmem:[#allocation5] sm:$0xf]  ;;  %v80_v8 = vld [vmem:[#allocation7] sm:$0xf]  ;;  %v52_v14 = vld [vmem:[#allocation2 + $0x10] sm:$0xff]  ;;  %s116_s2 = sshll.u32 %s219_s0, 4  ;;  %s117_s2 = int_to_ptr.vmem [resolvable:$true] %s116_s2 }
  0x26   :  { %v57_v1 = vshrl.u32 %v56_v0, 7  ;;  %v53_v15 = vld [vmem:[#allocation2 + $0x18] sm:$0xff]  ;;  %s190_s26 = scalar_lea.vmem %s117_s2, 512  ;;  %p195_p2 = scmp.lt.s32.totalorder %s117_s2, %s117_s2 }
  0x27   :  { %p191_p1 = scmp.ne.s32.totalorder %s117_s2, %s190_s26  ;;  %p196_p3 = scmp.lt.s32.totalorder %s190_s26, %s190_s26 }
  0x28   :  { %v58_v2 = vsub.s32 0, %v57_v1  ;;  %v62_v3 = vsub.s32 1, %v57_v1  ;;  %v66_v4 = vsub.s32 2, %v57_v1  ;;  %v70_v5 = vsub.s32 3, %v57_v1 }
  0x29   :  { %p197_p4 = por %p196_p3, %p195_p2 }
  0x2a   :  { %v59_v9 = vrot.slane %v54_v7, %v58_v2  ;;  %v85_v10 = vrot.slane %v80_v8, %v58_v2  ;;  %v63_v12 = vrot.slane %v54_v7, %v62_v3  ;;  %v89_v13 = vrot.slane %v80_v8, %v62_v3 }
  0x2b   :  { %v67_v16 = vrot.slane %v54_v7, %v66_v4  ;;  %v93_v17 = vrot.slane %v80_v8, %v66_v4  ;;  %v71_v18 = vrot.slane %v54_v7, %v70_v5  ;;  %v97_v19 = vrot.slane %v80_v8, %v70_v5  ;;  %p198_p5 = pnand %p197_p4, %p191_p1 }
  0x2c   :  { %v76_v20 = vsub.f32 %v50_v6, %v59_v9  ;;  %v77_v21 = vsub.f32 %v51_v11, %v63_v12 }
  0x2d   :  { %v78_v22 = vsub.f32 %v52_v14, %v67_v16  ;;  %v79_v23 = vsub.f32 %v53_v15, %v71_v18 }
  0x2e   :  { %v102_v24 = vmul.f32 %v85_v10, %v76_v20  ;;  %v103_v25 = vmul.f32 %v89_v13, %v77_v21 }
  0x2f   :  { %v104_v26 = vmul.f32 %v93_v17, %v78_v22  ;;  %v105_v27 = vmul.f32 %v97_v19, %v79_v23 }
  0x30   :  { %106 = vst [vmem:[#allocation8] sm:$0xff] %v102_v24  ;;  %107 = vst [vmem:[#allocation8 + $0x8] sm:$0xff] %v103_v25 }
  0x31   :  { %108 = vst [vmem:[#allocation8 + $0x10] sm:$0xff] %v104_v26  ;;  %109 = vst [vmem:[#allocation8 + $0x18] sm:$0xff] %v105_v27 }
  0x32   :  { %201 = shalt.err (!%p198_p5)
}
  0x33   :  { %119 = dma.vmem_to_hbm [thread:$0]  %s117_s2, 512, %s255_s3, [#allocation4]  }
  0x34   :  { %214 = dma.done.wait [#allocation4], 512  }
  0x35   :  { %215 = vsyncadd [#allocation4], 4294966784 }
  0x36   :  { %123 = vsyncpa [#allocation3], 1 }
  0x37   :  { %124 = vsyncpa [#allocation6], 1 }
  0x38   :  { %125 = vsyncpa [#allocation4], 1 }

</bundles_post_ra>
